<compile_context>
chip_gen: v7x
topology: tpu7x:2x2x1
jax: 0.10.0
libtpu: 0.0.40
codegen_flags: <defaults>
</compile_context>

<pallas_src>
import functools

import jax
import jax.numpy as jnp
from jax.experimental import pallas as pl
from jax.experimental.pallas import tpu as pltpu


# Per-block VMEM footprint budget: input + output double-buffered plus ~8 B/elem
# of f32 temporaries.  ~28 MiB keeps us under the explicit 40 MiB limit below.
DEFAULT_BLOCK_BUDGET_BYTES = 28 * 1024 * 1024
VMEM_LIMIT_BYTES = 40 * 1024 * 1024  # safe on v5e/v6e (128 MiB) and v7x (64 MiB)


def _round_up(a, b):
    return ((a + b - 1) // b) * b


def _cdiv(a, b):
    return (a + b - 1) // b


def _max_block_elems(itemsize, budget_bytes):
    # in + out double-buffered (4 * itemsize) + ~8 B/elem of f32 temps.
    per_elem = 4 * itemsize + 8
    return max(1, budget_bytes // per_elem)


# ---------------------------------------------------------------------------
# Kernels
# ---------------------------------------------------------------------------
def _l2_mid_kernel(x_ref, o_ref):
    # x_ref/o_ref: (tp, C, tq).  Reduce over the middle (normalized) axis; the
    # trailing axis stays on lanes.
    xf = x_ref[...].astype(jnp.float32)
    inv = jax.lax.rsqrt(jnp.sum(xf * xf, axis=1, keepdims=True))
    # Re-read the ref for the second use so the compiler can stream instead of
    # keeping xf live across the reduction (helps sub-32-bit inputs on v5e).
    o_ref[...] = (x_ref[...].astype(jnp.float32) * inv).astype(o_ref.dtype)


def _l2_last_kernel(x_ref, o_ref):
    # x_ref/o_ref: (tm, D).  Reduce over the last (lane) axis.
    xf = x_ref[...].astype(jnp.float32)
    inv = jax.lax.rsqrt(jnp.sum(xf * xf, axis=-1, keepdims=True))
    o_ref[...] = (x_ref[...].astype(jnp.float32) * inv).astype(o_ref.dtype)


def _sumsq_to_inv_kernel(x_ref, inv_ref, *, td, d_total):
    # Pass 1 of the huge-D path: accumulate sum(x^2) over D tiles into the
    # resident output block, then turn it into 1/||x|| on the last tile.
    k = pl.program_id(1)

    @pl.when(k == 0)
    def _():
        inv_ref[...] = jnp.zeros_like(inv_ref)

    xf = x_ref[...].astype(jnp.float32)
    # Mask the padded lanes of a partial edge tile so they don't pollute the sum.
    col = jax.lax.broadcasted_iota(jnp.int32, xf.shape, 1) + k * td
    xf = jnp.where(col < d_total, xf, 0.0)
    inv_ref[...] += jnp.sum(xf * xf, axis=-1, keepdims=True)

    @pl.when(k == pl.num_programs(1) - 1)
    def _():
        inv_ref[...] = jax.lax.rsqrt(inv_ref[...])


def _scale_kernel(x_ref, inv_ref, o_ref):
    # Pass 2 of the huge-D path: elementwise scale by the precomputed 1/||x||.
    o_ref[...] = (x_ref[...].astype(jnp.float32) * inv_ref[...]).astype(o_ref.dtype)


# ---------------------------------------------------------------------------
# Wrappers
# ---------------------------------------------------------------------------
def _normalize_last(x2d, budget):
    """Normalize over the last axis of a (N, D) array."""
    N, D = x2d.shape
    itemsize = jnp.dtype(x2d.dtype).itemsize
    max_elems = _max_block_elems(itemsize, budget)

    if 8 * D <= max_elems:
        # Single pass: full D on lanes, tile rows.
        tm = max(8, (max_elems // D) // 8 * 8)
        if N >= 32:
            # >= 4 parallel steps so each v7x TensorCore still pipelines.
            tm = min(tm, _round_up(_cdiv(N, 4), 8))
        elif N > 8:
            tm = min(tm, _round_up(_cdiv(N, 2), 8))
        tm = min(tm, _round_up(N, 8))
        grid = (_cdiv(N, tm),)
        return pl.pallas_call(
            _l2_last_kernel,
            out_shape=jax.ShapeDtypeStruct((N, D), x2d.dtype),
            grid_spec=pltpu.PrefetchScalarGridSpec(
                num_scalar_prefetch=0,
                grid=grid,
                in_specs=[pl.BlockSpec((tm, D), lambda i: (i, 0))],
                out_specs=pl.BlockSpec((tm, D), lambda i: (i, 0)),
            ),
            compiler_params=pltpu.CompilerParams(
                dimension_semantics=("parallel",),
                vmem_limit_bytes=VMEM_LIMIT_BYTES,
            ),
        )(x2d)

    # Huge D: two passes with a D-tiled reduction to keep blocks bounded.
    tm = 8
    td = max(128, (max_elems // tm) // 128 * 128)
    if td >= D:
        td = D
    grid = (_cdiv(N, tm), _cdiv(D, td))

    inv = pl.pallas_call(
        functools.partial(_sumsq_to_inv_kernel, td=td, d_total=D),
        out_shape=jax.ShapeDtypeStruct((N, 1), jnp.float32),
        grid_spec=pltpu.PrefetchScalarGridSpec(
            num_scalar_prefetch=0,
            grid=grid,
            in_specs=[pl.BlockSpec((tm, td), lambda i, k: (i, k))],
            out_specs=pl.BlockSpec((tm, 1), lambda i, k: (i, 0)),
        ),
        compiler_params=pltpu.CompilerParams(
            dimension_semantics=("parallel", "arbitrary"),
            vmem_limit_bytes=VMEM_LIMIT_BYTES,
        ),
    )(x2d)

    return pl.pallas_call(
        _scale_kernel,
        out_shape=jax.ShapeDtypeStruct((N, D), x2d.dtype),
        grid_spec=pltpu.PrefetchScalarGridSpec(
            num_scalar_prefetch=0,
            grid=grid,
            in_specs=[pl.BlockSpec((tm, td), lambda i, k: (i, k)),
                      pl.BlockSpec((tm, 1), lambda i, k: (i, 0))],
            out_specs=pl.BlockSpec((tm, td), lambda i, k: (i, k)),
        ),
        compiler_params=pltpu.CompilerParams(
            dimension_semantics=("parallel", "parallel"),
            vmem_limit_bytes=VMEM_LIMIT_BYTES,
        ),
    )(x2d, inv)


def _normalize_mid(x3d, budget):
    """Normalize over the middle axis of a (P, C, Q) array."""
    P, C, Q = x3d.shape
    itemsize = jnp.dtype(x3d.dtype).itemsize
    max_elems = _max_block_elems(itemsize, budget)
    slab = C * Q

    if slab <= max_elems:
        tq = Q
        tp = min(P, max(1, max_elems // slab))
        if P >= 4:
            # >= 4 parallel steps so each v7x TensorCore still double-buffers.
            tp = min(tp, _cdiv(P, 4))
        elif P >= 2:
            tp = min(tp, _cdiv(P, 2))
    else:
        # A single (C, Q) slab is too big for one block: tile Q on a second
        # parallel grid axis (reduction is over C, so no accumulator needed).
        # tq is a multiple of 128 so the lane axis stays dense.
        tp = 1
        tq = max(128, (max_elems // max(C, 1)) // 128 * 128)
        if tq >= Q:
            tq = Q
        # TODO(synk): if even a (1, C, 128) slab exceeds VMEM (enormous C), a
        # C-reduction accumulator pass (like the huge-D path) would be needed.

    grid = (_cdiv(P, tp), _cdiv(Q, tq))
    return pl.pallas_call(
        _l2_mid_kernel,
        out_shape=jax.ShapeDtypeStruct((P, C, Q), x3d.dtype),
        grid_spec=pltpu.PrefetchScalarGridSpec(
            num_scalar_prefetch=0,
            grid=grid,
            in_specs=[pl.BlockSpec((tp, C, tq), lambda i, j: (i, 0, j))],
            out_specs=pl.BlockSpec((tp, C, tq), lambda i, j: (i, 0, j)),
        ),
        compiler_params=pltpu.CompilerParams(
            dimension_semantics=("parallel", "parallel"),
            vmem_limit_bytes=VMEM_LIMIT_BYTES,
        ),
    )(x3d)


@functools.partial(jax.jit, static_argnames=("dim", "block_budget_bytes"))
def normalize(x, dim, block_budget_bytes=DEFAULT_BLOCK_BUDGET_BYTES):
    """JAX/Pallas equivalent of Normalize(dim).forward(x) = x / ||x||_2."""
    ndim = x.ndim
    dim = dim % ndim
    shape = x.shape

    C = shape[dim]
    P = 1
    for s in shape[:dim]:
        P *= s
    Q = 1
    for s in shape[dim + 1:]:
        Q *= s

    if Q == 1:
        out = _normalize_last(x.reshape(P, C), block_budget_bytes)
    else:
        out = _normalize_mid(x.reshape(P, C, Q), block_budget_bytes)
    return out.reshape(shape)


if __name__ == "__main__":
    key = jax.random.PRNGKey(0)
    k1, k2, k3 = jax.random.split(key, 3)

    def ref_norm(x, dim):
        xf = x.astype(jnp.float32)
        n = jnp.sqrt(jnp.sum(xf * xf, axis=dim, keepdims=True))
        return (xf / n).astype(x.dtype)

    # A: NCHW features, normalize the channel dim (typical Normalize(dim=1)).
    x = jax.random.normal(k1, (2, 4, 16, 16), dtype=jnp.float32)
    out = jax.block_until_ready(normalize(x, 1))
    assert out.shape == x.shape and out.dtype == x.dtype
    assert jnp.allclose(out, ref_norm(x, 1), atol=1e-5, rtol=1e-5)

    # B: normalize the last axis.
    out = jax.block_until_ready(normalize(x, -1))
    assert jnp.allclose(out, ref_norm(x, 3), atol=1e-5, rtol=1e-5)

    # C: tiny budget forces the Q-tiled mid path (tq = 128, 2x2 grid).
    out = jax.block_until_ready(normalize(x, 1, block_budget_bytes=16 * 1024))
    assert jnp.allclose(out, ref_norm(x, 1), atol=1e-5, rtol=1e-5)

    # D: tiny budget forces the two-pass D-tiled last-axis path (with a
    # partial edge tile over D, exercising the mask).
    y = jax.random.normal(k2, (16, 500), dtype=jnp.float32)
    out = jax.block_until_ready(normalize(y, -1, block_budget_bytes=32 * 1024))
    assert jnp.allclose(out, ref_norm(y, 1), atol=1e-5, rtol=1e-5)

    # E: Q not a multiple of 128 (7x7 feature map) -- correctness check.
    z = jax.random.normal(k3, (2, 3, 7, 7), dtype=jnp.float32)
    out = jax.block_until_ready(normalize(z, 1))
    assert jnp.allclose(out, ref_norm(z, 1), atol=1e-5, rtol=1e-5)

    print("KERNEL_OK")
</pallas_src>

<mosaic_0001>
module attributes {stable_mosaic.version = 11 : i64} {
  func.func @_l2_mid_kernel(%arg0: i32, %arg1: i32, %arg2: memref<1x4x256xf32, #tpu.memory_space<vmem>>, %arg3: memref<1x4x256xf32, #tpu.memory_space<vmem>>) attributes {dimension_semantics = [#tpu.dimension_semantics<parallel>, #tpu.dimension_semantics<parallel>], iteration_bounds = array<i64: 2, 1>, scalar_prefetch = 0 : i64, scratch_operands = 0 : i64, tpu.core_type = #tpu.core_type<tc>, window_params = [{transform_indices = @transform_0, window_bounds = array<i64: 1, 4, 256>}, {transform_indices = @transform_1, window_bounds = array<i64: 1, 4, 256>}]} {
    %c0 = arith.constant 0 : index
    %c0_0 = arith.constant 0 : index
    %c0_1 = arith.constant 0 : index
    %0 = vector.load %arg2[%c0, %c0_0, %c0_1] : memref<1x4x256xf32, #tpu.memory_space<vmem>>, vector<1x4x256xf32>
    %1 = arith.mulf %0, %0 : vector<1x4x256xf32>
    %cst = arith.constant dense<0.000000e+00> : vector<1x256xf32>
    %2 = vector.multi_reduction <add>, %1, %cst [1] : vector<1x4x256xf32> to vector<1x256xf32>
    %3 = vector.shape_cast %2 : vector<1x256xf32> to vector<1x1x256xf32>
    %4 = math.rsqrt %3 : vector<1x1x256xf32>
    %c0_2 = arith.constant 0 : index
    %c0_3 = arith.constant 0 : index
    %c0_4 = arith.constant 0 : index
    %5 = vector.load %arg2[%c0_2, %c0_3, %c0_4] : memref<1x4x256xf32, #tpu.memory_space<vmem>>, vector<1x4x256xf32>
    %6 = vector.broadcast %4 : vector<1x1x256xf32> to vector<1x4x256xf32>
    %7 = arith.mulf %5, %6 : vector<1x4x256xf32>
    %c0_5 = arith.constant 0 : index
    %c0_6 = arith.constant 0 : index
    %c0_7 = arith.constant 0 : index
    %8 = vector.load %arg3[%c0_5, %c0_6, %c0_7] : memref<1x4x256xf32, #tpu.memory_space<vmem>>, vector<1x4x256xf32>
    tpu.vector_store %arg3[%c0_5, %c0_6, %c0_7], %7 {strides = array<i32>} : memref<1x4x256xf32, #tpu.memory_space<vmem>>, vector<1x4x256xf32>,
    return
  }
  func.func @transform_0(%arg0: i32, %arg1: i32) -> (i32, i32, i32) {
    %c0_i32 = arith.constant 0 : i32
    %c0_i32_0 = arith.constant 0 : i32
    return %arg0, %c0_i32, %arg1 : i32, i32, i32
  }
  func.func @transform_1(%arg0: i32, %arg1: i32) -> (i32, i32, i32) {
    %c0_i32 = arith.constant 0 : i32
    %c0_i32_0 = arith.constant 0 : i32
    return %arg0, %c0_i32, %arg1 : i32, i32, i32
  }
}

</mosaic_0001>

<bundles_post_ra>
// kernel: normalize.1
= control target key start
LH: loop header
LB: loop body
LE: loop exit
PB: predicated region body
PF: predicated region fallthrough
CT: control target
= control target key end

     0   :  { %s346_s6 = smov 0   ;;  %s348_s7 = smov 0   ;;  %s379_s0 = inlined_call_operand.vmem [shape: f32[2,4,256], index: 0, kind: input, shape index: {}]   ;;  %s380_s1 = inlined_call_operand.vmem [shape: f32[2,4,256], index: 1, kind: output, shape index: {}]  }
   0x1   :  { %s350_s8 = smov 0  }
   0x2 LB: > { %s23_s9 = sadd.s32 1, %s330_s7  ;;  %p275_p0 = scmp.ge.s32.totalorder %s334_s8, 1  ;;  %s334_s8 = sphi %s350_s8, %s11_s8   ;;  %s330_s7 = sphi %s348_s7, %s382_s7   ;;  %s326_s6 = sphi %s346_s6, %s381_s6  }
   0x3   : > { %p25_p1 = scmp.ge.s32.totalorder %s23_s9, 2  ;;  %p108_p2 = scmp.lt.s32.totalorder %s334_s8, 3 }
   0x5   : > { %s384_s9 = smov (%p25_p1, %s23_s9), 0  ;;  %p109_p3 = pnand %p275_p0, %p108_p2 }
   0x6   : > { %p137_p4 = scmp.lt.s32.totalorder (!%p109_p3), %s326_s6, 1  ;;  %vm161_vm0 = vcmask (!%p109_p3), 1043456  }
   0x7   : > { %112 = sbr.rel (%p109_p3) target bundleno = 51 (0x33), region = 24 }
   0xe   : > { %s386_s6 = smov (!%p137_p4, %s326_s6), 1 }
   0xf   : > { %s282_s10 = sshll.u32 %s386_s6, 3 }
  0x10   : > { %s144_s13 = scalar_lea.vmem %s379_s0, %s282_s10  ;;  %s154_s16 = scalar_lea.vmem %s380_s1, %s282_s10 }
  0x11   : > { %v156_v0 = vld [vmem:[%s144_s13] sm:$0xff] }
  0x12   : > { %v157_v1 = vmul.f32 %v156_v0, %v156_v0 }
  0x14   : > { %v159_v2 = vcombine.high %v157_v1, %v157_v1  ;;  %v162_v3 = vsel %vm161_vm0, %v157_v1, 0.0 }
  0x15   : > { %v163_v4 = vrot.slane %v162_v3, 4 }
  0x16   : > { %v169_v5 = vsel %vm161_vm0, %v159_v2, 0.0 }
  0x17   : > { %v164_v6 = vadd.f32 %v163_v4, %v162_v3  ;;  %v170_v7 = vrot.slane %v169_v5, 4 }
  0x19   : > { %v165_v8 = vrot.slane %v164_v6, 2  ;;  %v171_v9 = vadd.f32 %v170_v7, %v169_v5 }
  0x1b   : > { %v166_v10 = vadd.f32 %v165_v8, %v164_v6  ;;  %v172_v11 = vrot.slane %v171_v9, 2 }
  0x1d   : > { %v167_v12 = vrot.slane %v166_v10, 1  ;;  %v173_v13 = vadd.f32 %v172_v11, %v171_v9 }
  0x1f   : > { %v168_v14 = vadd.f32 %v167_v12, %v166_v10  ;;  %v174_v15 = vrot.slane %v173_v13, 1 }
  0x21   : > { %v175_v16 = vadd.f32 %v174_v15, %v173_v13  ;;  %308 = vrsqrt.f32 %v168_v14 }
  0x23   : > { %310 = vrsqrt.f32 %v175_v16 }
  0x2b   : > { %v309_v17 = vpop.eup %308 }
  0x2d   : > { %v311_v18 = vpop.eup %310 }
  0x2e   : > { %v180_v19 = vcombine.low %v309_v17, %v311_v18 }
  0x30   : > { %v182_v20 = vmul.f32 %v180_v19, %v156_v0 }
  0x32   : > { %183 = vst [vmem:[%s154_s16] sm:$0xff] %v182_v20 }
  0x33 PF: > { %s11_s8 = sadd.s32 1, %s334_s8   ;;  %s381_s6 = smov %s330_s7 }
  0x34   : > { %p8_p5 = scmp.ge.s32.totalorder %s11_s8, 4   ;;  %s382_s7 = smov %s384_s9 }
  0x36   :  { %10 = sbr.rel (!%p8_p5) target bundleno = 2 (0x2), region = 54 }

</bundles_post_ra>
